<compile_context>
chip_gen: v5e
topology: v5e:2x2
jax: 0.10.0
libtpu: 0.0.40
codegen_flags: <defaults>
</compile_context>

<pallas_src>
import jax
import jax.numpy as jnp
from jax.experimental import pallas as pl
from jax.experimental.pallas import tpu as pltpu


def _round_up(a, b):
    return ((a + b - 1) // b) * b


# ------------------------------ kernels -------------------------------------

def _ffn_kernel_resident(x_ref, w1_ref, b1_ref, w2_ref, b2_ref, o_ref):
    """Full W1/W2 resident in VMEM; grid = (row tiles,)."""
    xb = x_ref[...].astype(jnp.bfloat16)
    h = jnp.dot(xb, w1_ref[...], preferred_element_type=jnp.float32)
    h = jnp.maximum(h + b1_ref[...], 0.0)
    o_ref[...] = (
        jnp.dot(h.astype(w2_ref.dtype), w2_ref[...],
                preferred_element_type=jnp.float32)
        + b2_ref[...]
    ).astype(o_ref.dtype)


def _ffn_kernel_tiled(x_ref, w1_ref, b1_ref, w2_ref, b2_ref, o_ref):
    """Hidden dim tiled; grid = (row tiles, hidden chunks).

    The f32 output block has a constant block index over the hidden axis, so
    it stays resident and doubles as the accumulator (no scratch needed).
    """
    hk = pl.program_id(1)

    @pl.when(hk == 0)
    def _():
        o_ref[...] = jnp.zeros_like(o_ref)

    xb = x_ref[...].astype(jnp.bfloat16)
    h = jnp.dot(xb, w1_ref[...], preferred_element_type=jnp.float32)
    h = jnp.maximum(h + b1_ref[...], 0.0)       # exact: each hidden unit lives in one chunk
    o_ref[...] += jnp.dot(h.astype(w2_ref.dtype), w2_ref[...],
                          preferred_element_type=jnp.float32)

    @pl.when(hk == pl.num_programs(1) - 1)
    def _():
        o_ref[...] += b2_ref[...]


# --------------------------- tile planning ----------------------------------

def _chip_config():
    kind = ""
    try:
        kind = jax.devices()[0].device_kind.lower()
    except Exception:
        pass
    if "v6" in kind:
        # v6e: 128 MiB VMEM, 1 TC, 918 TF/s vs ~1.4 TB/s -> tm ~ 1024 to be MXU-bound.
        return {"vmem_bytes": 128 << 20, "num_cores": 1, "tm": 1024}
    if "v5 lite" in kind or "v5e" in kind or "v5lite" in kind:
        # v5e: 128 MiB VMEM, 1 TC, 197 TF/s vs ~0.82 TB/s -> tm ~ 256 suffices.
        return {"vmem_bytes": 128 << 20, "num_cores": 1, "tm": 256}
    if "v7" in kind or "tpu7" in kind:
        # v7x: 64 MiB VMEM, 2 TCs -> tm ~ 512, prefer shrinking th before tm.
        # TODO(synk): optionally stream W1/W2 as fp8 on v7x in the decode regime.
        return {"vmem_bytes": 64 << 20, "num_cores": 2, "tm": 512}
    # Unknown generation: conservative VMEM budget, assume a megacore part.
    return {"vmem_bytes": 64 << 20, "num_cores": 2, "tm": 512}


def _plan(M, Cp, Hp, x_bytes, cfg):
    budget = int(cfg["vmem_bytes"] * 0.7)
    m8 = _round_up(max(M, 1), 8)
    tm = min(cfg["tm"], m8)

    # Megacore: make sure the "parallel" M axis has >= num_cores row tiles
    # (otherwise one TensorCore idles) when M is large enough to matter.
    if cfg["num_cores"] > 1 and m8 >= cfg["num_cores"] * 256:
        while -(-m8 // tm) < cfg["num_cores"] and tm > 256:
            tm = max(256, _round_up(tm // 2, 256))

    def resident_ws(tm_):
        return (2 * 2 * Cp * Hp * 2          # W1 + W2 bf16 (counted double-buffered)
                + 2 * tm_ * Cp * x_bytes     # x tile, double-buffered
                + 2 * tm_ * Cp * 4           # f32 output tile, double-buffered
                + 2 * (Hp + Cp) * 4          # biases
                + tm_ * Hp * 6)              # hidden intermediate (f32 + bf16 copy)

    def tiled_ws(tm_, th_):
        return (2 * tm_ * Cp * x_bytes
                + 2 * Cp * th_ * 2 + 2 * th_ * Cp * 2
                + 2 * tm_ * Cp * 4
                + 2 * (th_ + Cp) * 4
                + tm_ * th_ * 6)

    # Prefer resident weights: W1/W2 stream from HBM exactly once per call
    # instead of once per row tile.
    if resident_ws(tm) <= budget:
        return {"mode": "resident", "tm": tm, "th": Hp, "ws": resident_ws(tm)}

    # Otherwise tile the hidden (reduction) dim.  Shrink th before tm: tm sets
    # the weight-traffic arithmetic intensity (AI ~ tm flops/byte); th is kept
    # a multiple of 256 when possible to match the 256-wide MXU.
    th_opts = [t for t in (512, 256, 128) if Hp % t == 0] or [Hp]
    for th in th_opts:
        if tiled_ws(tm, th) <= budget:
            return {"mode": "tiled", "tm": tm, "th": th, "ws": tiled_ws(tm, th)}
    th = th_opts[-1]
    while tm > 8 and tiled_ws(tm, th) > budget:
        tm = max(8, _round_up(tm // 2, 8))
    return {"mode": "tiled", "tm": tm, "th": th, "ws": tiled_ws(tm, th)}


# ------------------------------ wrapper -------------------------------------

def _pad2(a, rows, cols):
    pr, pc = rows - a.shape[0], cols - a.shape[1]
    return a if (pr == 0 and pc == 0) else jnp.pad(a, ((0, pr), (0, pc)))


def feed_forward(x, w1, b1, w2, b2):
    """x: (B, T, C).  Returns (B, T, C) = relu(x @ w1 + b1) @ w2 + b2."""
    orig_dtype = x.dtype
    B, T, C = x.shape
    H = w1.shape[1]          # 4 * C
    M = B * T
    x_bytes = jnp.dtype(x.dtype).itemsize

    cfg = _chip_config()

    # Lane-dense padding of feature / hidden dims (only when not already
    # 128-aligned).  Zero-padded columns/rows contribute exactly zero.
    Cp = _round_up(C, 128)
    Hp = _round_up(H, 128)

    plan = _plan(M, Cp, Hp, x_bytes, cfg)
    tm, th = plan["tm"], plan["th"]
    grid_m = pl.cdiv(M, tm)   # ragged last row tile handled by Pallas; no row pad

    # Activations stay in their native dtype (cast to bf16 inside the kernel).
    x2d = x.reshape(M, C)
    if Cp != C:
        x2d = jnp.pad(x2d, ((0, 0), (0, Cp - C)))
    # Weights streamed as bf16 (f32 MXU accumulation); biases in f32.
    w1b = _pad2(w1, Cp, Hp).astype(jnp.bfloat16)
    w2b = _pad2(w2, Hp, Cp).astype(jnp.bfloat16)
    b1_2d = _pad2(b1.reshape(1, H).astype(jnp.float32), 1, Hp)
    b2_2d = _pad2(b2.reshape(1, C).astype(jnp.float32), 1, Cp)

    if plan["mode"] == "resident":
        grid = (grid_m,)
        in_specs = [
            pl.BlockSpec((tm, Cp), lambda i: (i, 0)),   # x rows
            pl.BlockSpec((Cp, Hp), lambda i: (0, 0)),   # W1 (resident, DMA'd once)
            pl.BlockSpec((1, Hp), lambda i: (0, 0)),    # b1
            pl.BlockSpec((Hp, Cp), lambda i: (0, 0)),   # W2 (resident, DMA'd once)
            pl.BlockSpec((1, Cp), lambda i: (0, 0)),    # b2
        ]
        out_spec = pl.BlockSpec((tm, Cp), lambda i: (i, 0))
        kernel = _ffn_kernel_resident
        dims = ("parallel",)
        weight_reads = 1
    else:
        grid = (grid_m, Hp // th)   # hidden (reduction) axis innermost
        in_specs = [
            pl.BlockSpec((tm, Cp), lambda i, h: (i, 0)),   # x rows (resident over h)
            pl.BlockSpec((Cp, th), lambda i, h: (0, h)),   # W1 hidden slice
            pl.BlockSpec((1, th), lambda i, h: (0, h)),    # b1 slice
            pl.BlockSpec((th, Cp), lambda i, h: (h, 0)),   # W2 hidden slice
            pl.BlockSpec((1, Cp), lambda i, h: (0, 0)),    # b2
        ]
        out_spec = pl.BlockSpec((tm, Cp), lambda i, h: (i, 0))
        kernel = _ffn_kernel_tiled
        dims = ("parallel", "arbitrary")
        weight_reads = grid_m

    vmem_limit = int(min(cfg["vmem_bytes"] - (4 << 20),
                         max(plan["ws"] * 5 // 4 + (2 << 20), 16 << 20)))

    cost = pl.CostEstimate(
        flops=4 * M * Cp * Hp,                      # two GEMMs
        transcendentals=0,
        bytes_accessed=(M * Cp * x_bytes            # activations
                        + weight_reads * 2 * Cp * Hp * 2   # W1+W2 per row tile
                        + (Hp + Cp) * 4             # biases
                        + M * Cp * 4),              # output (f32)
    )

    out2d = pl.pallas_call(
        kernel,
        out_shape=jax.ShapeDtypeStruct((M, Cp), jnp.float32),
        grid_spec=pltpu.PrefetchScalarGridSpec(
            num_scalar_prefetch=0,
            grid=grid,
            in_specs=in_specs,
            out_specs=out_spec,
        ),
        compiler_params=pltpu.CompilerParams(
            dimension_semantics=dims,
            vmem_limit_bytes=vmem_limit,
        ),
        cost_estimate=cost,
    )(x2d, w1b, b1_2d, w2b, b2_2d)

    if Cp != C:
        out2d = out2d[:, :C]
    return out2d.reshape(B, T, C).astype(orig_dtype)


def init_params(key, embed_dim, dtype=jnp.float32):
    """Deterministic synthetic params matching nn.Linear shapes.

    PyTorch: net[0].weight (4C, C), net[0].bias (4C,)
             net[2].weight (C, 4C), net[2].bias (C,)
    We store weights transposed to (in, out) for x @ W."""
    k1, k2, k3, k4 = jax.random.split(key, 4)
    C, H = embed_dim, 4 * embed_dim
    s1 = 1.0 / jnp.sqrt(C)
    s2 = 1.0 / jnp.sqrt(H)
    w1 = jax.random.uniform(k1, (C, H), dtype, -s1, s1)
    b1 = jax.random.uniform(k2, (H,), dtype, -s1, s1)
    w2 = jax.random.uniform(k3, (H, C), dtype, -s2, s2)
    b2 = jax.random.uniform(k4, (C,), dtype, -s2, s2)
    return w1, b1, w2, b2


if __name__ == "__main__":
    B, T, C = 2, 8, 32          # batch, seq, embed_dim (hidden = 4*C = 128)
    key = jax.random.PRNGKey(0)
    kx, kp = jax.random.split(key)

    x = jax.random.normal(kx, (B, T, C), jnp.float32)
    w1, b1, w2, b2 = init_params(kp, C)

    out = jax.block_until_ready(feed_forward(x, w1, b1, w2, b2))
    assert out.shape == (B, T, C)

    # Tight check vs. a JAX reference emulating bf16 MXU inputs with f32 accumulation.
    xb = x.astype(jnp.bfloat16).astype(jnp.float32)
    w1e = w1.astype(jnp.bfloat16).astype(jnp.float32)
    w2e = w2.astype(jnp.bfloat16).astype(jnp.float32)
    h = jnp.maximum(xb @ w1e + b1, 0.0).astype(jnp.bfloat16).astype(jnp.float32)
    ref_bf16 = h @ w2e + b2
    assert jnp.allclose(out, ref_bf16, atol=1e-3, rtol=1e-3), \
        float(jnp.max(jnp.abs(out - ref_bf16)))

    # Looser sanity check vs. the pure-f32 reference (documents the bf16 trade-off).
    ref_f32 = jnp.maximum(x @ w1 + b1, 0.0) @ w2 + b2
    assert jnp.allclose(out, ref_f32, atol=5e-2, rtol=5e-2)

    print("KERNEL_OK")
</pallas_src>

<mosaic_0001>
module attributes {stable_mosaic.version = 11 : i64} {
  func.func @_ffn_kernel_resident(%arg0: i32, %arg1: memref<16x128xf32, #tpu.memory_space<vmem>>, %arg2: memref<128x128xbf16, #tpu.memory_space<vmem>>, %arg3: memref<1x128xf32, #tpu.memory_space<vmem>>, %arg4: memref<128x128xbf16, #tpu.memory_space<vmem>>, %arg5: memref<1x128xf32, #tpu.memory_space<vmem>>, %arg6: memref<16x128xf32, #tpu.memory_space<vmem>>) attributes {dimension_semantics = [#tpu.dimension_semantics<parallel>], iteration_bounds = array<i64: 1>, scalar_prefetch = 0 : i64, scratch_operands = 0 : i64, tpu.core_type = #tpu.core_type<tc>, window_params = [{transform_indices = @transform_0, window_bounds = array<i64: 16, 128>}, {pipeline_mode = #tpu.pipeline_mode<synchronous>, transform_indices = @transform_1, window_bounds = array<i64: 128, 128>}, {pipeline_mode = #tpu.pipeline_mode<synchronous>, transform_indices = @transform_2, window_bounds = array<i64: 1, 128>}, {pipeline_mode = #tpu.pipeline_mode<synchronous>, transform_indices = @transform_3, window_bounds = array<i64: 128, 128>}, {pipeline_mode = #tpu.pipeline_mode<synchronous>, transform_indices = @transform_4, window_bounds = array<i64: 1, 128>}, {transform_indices = @transform_5, window_bounds = array<i64: 16, 128>}]} {
    %c0 = arith.constant 0 : index
    %c0_0 = arith.constant 0 : index
    %0 = vector.load %arg1[%c0, %c0_0] : memref<16x128xf32, #tpu.memory_space<vmem>>, vector<16x128xf32>
    %1 = arith.truncf %0 : vector<16x128xf32> to vector<16x128xbf16>
    %c0_1 = arith.constant 0 : index
    %c0_2 = arith.constant 0 : index
    %2 = vector.load %arg2[%c0_1, %c0_2] : memref<128x128xbf16, #tpu.memory_space<vmem>>, vector<128x128xbf16>
    %cst = arith.constant dense<0.000000e+00> : vector<16x128xf32>
    %3 = tpu.matmul %1, %2, %cst {dimension_numbers = #tpu.dot_dimension_numbers<[1], [0], [0], [1], [0, 0, 1, 1], [], []>} : vector<16x128xbf16>, vector<128x128xbf16>, vector<16x128xf32> -> vector<16x128xf32>
    %c0_3 = arith.constant 0 : index
    %c0_4 = arith.constant 0 : index
    %4 = vector.load %arg3[%c0_3, %c0_4] : memref<1x128xf32, #tpu.memory_space<vmem>>, vector<1x128xf32>
    %5 = vector.broadcast %4 : vector<1x128xf32> to vector<16x128xf32>
    %6 = arith.addf %3, %5 : vector<16x128xf32>
    %cst_5 = arith.constant 0.000000e+00 : f32
    %7 = vector.broadcast %cst_5 : f32 to vector<16x128xf32>
    %8 = arith.maximumf %6, %7 : vector<16x128xf32>
    %9 = arith.truncf %8 : vector<16x128xf32> to vector<16x128xbf16>
    %c0_6 = arith.constant 0 : index
    %c0_7 = arith.constant 0 : index
    %10 = vector.load %arg4[%c0_6, %c0_7] : memref<128x128xbf16, #tpu.memory_space<vmem>>, vector<128x128xbf16>
    %cst_8 = arith.constant dense<0.000000e+00> : vector<16x128xf32>
    %11 = tpu.matmul %9, %10, %cst_8 {dimension_numbers = #tpu.dot_dimension_numbers<[1], [0], [0], [1], [0, 0, 1, 1], [], []>} : vector<16x128xbf16>, vector<128x128xbf16>, vector<16x128xf32> -> vector<16x128xf32>
    %c0_9 = arith.constant 0 : index
    %c0_10 = arith.constant 0 : index
    %12 = vector.load %arg5[%c0_9, %c0_10] : memref<1x128xf32, #tpu.memory_space<vmem>>, vector<1x128xf32>
    %13 = vector.broadcast %12 : vector<1x128xf32> to vector<16x128xf32>
    %14 = arith.addf %11, %13 : vector<16x128xf32>
    %c0_11 = arith.constant 0 : index
    %c0_12 = arith.constant 0 : index
    %15 = vector.load %arg6[%c0_11, %c0_12] : memref<16x128xf32, #tpu.memory_space<vmem>>, vector<16x128xf32>
    tpu.vector_store %arg6[%c0_11, %c0_12], %14 {strides = array<i32>} : memref<16x128xf32, #tpu.memory_space<vmem>>, vector<16x128xf32>,
    return
  }
  func.func @transform_0(%arg0: i32) -> (i32, i32) {
    %c0_i32 = arith.constant 0 : i32
    %c0_i32_0 = arith.constant 0 : i32
    return %arg0, %c0_i32 : i32, i32
  }
  func.func @transform_1(%arg0: i32) -> (i32, i32) {
    %c0_i32 = arith.constant 0 : i32
    %c0_i32_0 = arith.constant 0 : i32
    %c0_i32_1 = arith.constant 0 : i32
    return %c0_i32, %c0_i32_0 : i32, i32
  }
  func.func @transform_2(%arg0: i32) -> (i32, i32) {
    %c0_i32 = arith.constant 0 : i32
    %c0_i32_0 = arith.constant 0 : i32
    %c0_i32_1 = arith.constant 0 : i32
    return %c0_i32, %c0_i32_0 : i32, i32
  }
  func.func @transform_3(%arg0: i32) -> (i32, i32) {
    %c0_i32 = arith.constant 0 : i32
    %c0_i32_0 = arith.constant 0 : i32
    %c0_i32_1 = arith.constant 0 : i32
    return %c0_i32, %c0_i32_0 : i32, i32
  }
  func.func @transform_4(%arg0: i32) -> (i32, i32) {
    %c0_i32 = arith.constant 0 : i32
    %c0_i32_0 = arith.constant 0 : i32
    %c0_i32_1 = arith.constant 0 : i32
    return %c0_i32, %c0_i32_0 : i32, i32
  }
  func.func @transform_5(%arg0: i32) -> (i32, i32) {
    %c0_i32 = arith.constant 0 : i32
    %c0_i32_0 = arith.constant 0 : i32
    return %arg0, %c0_i32 : i32, i32
  }
}

</mosaic_0001>

<bundles_post_ra>
// kernel: tpu_custom_call.1
= control target key start
LH: loop header
LB: loop body
LE: loop exit
PB: predicated region body
PF: predicated region fallthrough
CT: control target
= control target key end

     0   :  { %10 = vsyncpa [#allocation3], 0  ;;  %s514_s0 = inlined_call_operand.hbm [shape: f32[16,128], index: 0, kind: input, shape index: {}]   ;;  %s515_s1 = inlined_call_operand.hbm [shape: bf16[128,128], index: 1, kind: input, shape index: {}]   ;;  %s516_s2 = inlined_call_operand.vmem [shape: f32[1,128], index: 2, kind: input, shape index: {}]   ;;  %s517_s3 = inlined_call_operand.hbm [shape: bf16[128,128], index: 3, kind: input, shape index: {}]   ;;  %s518_s4 = inlined_call_operand.vmem [shape: f32[1,128], index: 4, kind: input, shape index: {}]   ;;  %s519_s5 = inlined_call_operand.hbm [shape: f32[16,128], index: 5, kind: output, shape index: {}]  }
   0x1   :  { %11 = vsyncpa [#allocation6], 0  ;;  %s30_s20 = sshll.u32 %s515_s1, 4  ;;  %s31_s20 = int_to_ptr.hbm [resolvable:$true] %s30_s20 }
   0x2   :  { %12 = vsyncpa [#allocation4], 0  ;;  %s452_s21 = smov [#allocation5]   ;;  %s17_s25 = sshll.u32 %s514_s0, 4  ;;  %s18_s25 = int_to_ptr.hbm [resolvable:$true] %s17_s25 }
   0x3   :  { %s32_s22 = sshll.u32 %s452_s21, 4  ;;  %s453_s26 = smov 64   ;;  %s33_s22 = int_to_ptr.vmem [resolvable:$true] %s32_s22 }
   0x4   :  { %s454_s27 = smov 4   ;;  %s455_s28 = smov [#allocation2]  }
   0x5   :  { %38 = dma.hbm_to_vmem [thread:$0]  %s31_s20, 1024, %s33_s22, [#allocation6], %s453_s26, %s453_s26, %s454_s27  }
   0x6   :  { %s19_s29 = sshll.u32 %s455_s28, 4  ;;  %s456_s30 = smov 128   ;;  %s20_s29 = int_to_ptr.vmem [resolvable:$true] %s19_s29 }
   0x7   :  { %s457_s6 = smov 8   ;;  %s45_s8 = sshll.u32 %s517_s3, 4  ;;  %s46_s8 = int_to_ptr.hbm [resolvable:$true] %s45_s8 }
   0x8   :  { %25 = dma.hbm_to_vmem [thread:$0]  %s18_s25, 256, %s20_s29, [#allocation3], %s456_s30, %s456_s30, %s457_s6  }
   0x9   :  { %s458_s9 = smov [#allocation7]  }
   0xa   :  { %s47_s0 = sshll.u32 %s458_s9, 4  ;;  %s48_s0 = int_to_ptr.vmem [resolvable:$true] %s47_s0 }
   0xb   :  { %53 = dma.hbm_to_vmem [thread:$0]  %s46_s8, 1024, %s48_s0, [#allocation6], %s453_s26, %s453_s26, %s454_s27  }
   0xc   :  { %446 = dma.done.wait [#allocation3], 256  }
   0xd   :  { %447 = vsyncadd [#allocation3], 4294967040 }
   0xe   :  { %448 = dma.done.wait [#allocation6], 2048  }
   0xf   :  { %449 = vsyncadd [#allocation6], 4294965248  ;;  %v331_v0 = vld [vmem:[#allocation5 + $0x38] sm:$0xff]  ;;  %v330_v1 = vld [vmem:[#allocation5 + $0x30] sm:$0xff]  ;;  %s459_s13 = smov [#allocation8]  }
  0x10   :  { %139 = vmatpush.bf16.msra.mxu0 %v331_v0  ;;  %v339_v2 = vld [vmem:[#allocation7 + $0x38] sm:$0xff]  ;;  %v338_v3 = vld [vmem:[#allocation7 + $0x30] sm:$0xff]  ;;  %v329_v4 = vld [vmem:[#allocation5 + $0x28] sm:$0xff]  ;;  %s244_s14 = sshll.u32 %s459_s13, 4  ;;  %s245_s14 = int_to_ptr.vmem [resolvable:$true] %s244_s14 }
  0x11   :  { %224 = vmatpush.bf16.msra.mxu1 %v339_v2  ;;  %v337_v5 = vld [vmem:[#allocation7 + $0x28] sm:$0xff]  ;;  %v328_v6 = vld [vmem:[#allocation5 + $0x20] sm:$0xff]  ;;  %v327_v8 = vld [vmem:[#allocation5 + $0x18] sm:$0xff] }
  0x12   :  { %v336_v7 = vld [vmem:[#allocation7 + $0x20] sm:$0xff]  ;;  %v326_v9 = vld [vmem:[#allocation5 + $0x10] sm:$0xff]  ;;  %v325_v10 = vld [vmem:[#allocation5 + $0x8] sm:$0xff] }
  0x13   :  { %v324_v11 = vld [vmem:[#allocation5] sm:$0xff]  ;;  %v68_v12 = vld [vmem:[#allocation2] sm:$0xff]  ;;  %v69_v13 = vld [vmem:[#allocation2 + $0x8] sm:$0xff] }
  0x14   :  { %140 = vmatpush.bf16.msra.mxu0 %v330_v1  ;;  %v70_v14 = vpack.c.bf16 %v69_v13, %v68_v12  ;;  %v335_v15 = vld [vmem:[#allocation7 + $0x18] sm:$0xff]  ;;  %v334_v16 = vld [vmem:[#allocation7 + $0x10] sm:$0xff]  ;;  %v333_v17 = vld [vmem:[#allocation7 + $0x8] sm:$0xff] }
  0x15   :  { %225 = vmatpush.bf16.msra.mxu1 %v338_v3  ;;  %v332_v18 = vld [vmem:[#allocation7] sm:$0xff]  ;;  %v348_v20 = vld [vmem:[%s516_s2] ss:$0 sm:$0xff]  ;;  %s246_s2 = sshll.u32 %s519_s5, 4  ;;  %s247_s2 = int_to_ptr.hbm [resolvable:$true] %s246_s2 }
  0x16   :  { %v349_v27 = vld [vmem:[%s518_s4] ss:$0 sm:$0xff] }
  0x18   :  { %141 = vmatpush.bf16.msra.mxu0 %v329_v4 }
  0x19   :  { %226 = vmatpush.bf16.msra.mxu1 %v337_v5 }
  0x1c   :  { %142 = vmatpush.bf16.msra.mxu0 %v328_v6 }
  0x1d   :  { %227 = vmatpush.bf16.msra.mxu1 %v336_v7 }
  0x20   :  { %143 = vmatpush.bf16.msra.mxu0 %v327_v8 }
  0x21   :  { %228 = vmatpush.bf16.msra.mxu1 %v335_v15 }
  0x24   :  { %144 = vmatpush.bf16.msra.mxu0 %v326_v9 }
  0x25   :  { %229 = vmatpush.bf16.msra.mxu1 %v334_v16 }
  0x28   :  { %145 = vmatpush.bf16.msra.mxu0 %v325_v10 }
  0x29   :  { %230 = vmatpush.bf16.msra.mxu1 %v333_v17 }
  0x2c   :  { %146 = vmatpush.bf16.msra.mxu0 %v324_v11 }
  0x2d   :  { %231 = vmatpush.bf16.msra.mxu1 %v332_v18 }
  0x2f   :  { %147 = vmatmul.bf16.vlgmr.msra.gmra.mxu0 %v70_v14 }
  0xac   :  { %v148_v19 = vpop.f32.mrf.mxu0 }
  0xad   :  { %v149_v21 = vadd.f32 %v348_v20, %v148_v19 }
  0xaf   :  { %v153_v24 = vmax.f32 %v149_v21, 0.0 }
  0xb4   :  { %v150_v22 = vpop.f32.mrf.mxu0 }
  0xb5   :  { %v151_v23 = vadd.f32 %v348_v20, %v150_v22 }
  0xb7   :  { %v154_v25 = vmax.f32 %v151_v23, 0.0 }
  0xb9   :  { %v155_v26 = vpack.c.bf16 %v154_v25, %v153_v24 }
  0xbb   :  { %232 = vmatmul.bf16.vlgmr.msra.gmra.mxu1 %v155_v26 }
 0x138   :  { %v233_v28 = vpop.f32.mrf.mxu1 }
 0x139   :  { %v234_v29 = vadd.f32 %v349_v27, %v233_v28 }
 0x13b   :  { %238 = vst [vmem:[#allocation8] sm:$0xff] %v234_v29 }
 0x140   :  { %v235_v30 = vpop.f32.mrf.mxu1 }
 0x141   :  { %v236_v31 = vadd.f32 %v349_v27, %v235_v30 }
 0x143   :  { %239 = vst [vmem:[#allocation8 + $0x8] sm:$0xff] %v236_v31 }
 0x144   :  { %252 = dma.vmem_to_hbm [thread:$0]  %s245_s14, 256, %s247_s2, [#allocation4], %s456_s30, %s456_s30, %s457_s6  }
 0x145   :  { %450 = dma.done.wait [#allocation4], 256  }
 0x146   :  { %451 = vsyncadd [#allocation4], 4294967040 }
 0x147   :  { %257 = vsyncpa [#allocation3], 1 }
 0x148   :  { %258 = vsyncpa [#allocation6], 1 }
 0x149   :  { %259 = vsyncpa [#allocation4], 1 }

</bundles_post_ra>
